<compile_context>
chip_gen: v5e
topology: v5e:2x2
jax: 0.10.0
libtpu: 0.0.40
codegen_flags: <defaults>
</compile_context>

<pallas_src>
import numpy as np
import jax
import jax.numpy as jnp
from jax.experimental import pallas as pl
from jax.experimental.pallas import tpu as pltpu

# ------------------------- small, forward-consistent config ------------------
DATA_DIM       = 32
DIM_PROTO      = 16
DIM_CLS        = 8
NUM_CLASS      = 4
N_AFE_A_ALLOC  = 4
N_AFE_R_ALLOC  = 2
N_AFE_A_SELECT = 2
N_AFE_R_SELECT = 1
N_NBS_PER_HOP  = [2, 1]
SUM_NBS        = sum(N_NBS_PER_HOP)
BATCH          = 8
N_NODES        = 20
W_ATOM_R       = 0.0   # self.w_atom_r (non-trainable parameter, init 0.0)

N_ATOMS  = N_AFE_A_SELECT + N_AFE_R_SELECT * SUM_NBS
ATOM_FLT = N_ATOMS * DIM_PROTO


# ------------------------------ fused Pallas kernel ---------------------------
def hcpn_fused_kernel(c_ref, nei_ref, w_ref, afea_ref, afer_ref,
                      wcls_ref, bcls_ref, y_ref,
                      atom_ref, preds_ref, loss_ref):
    """Fused HCPN hot path.

    c_ref:    (B, D)        center features                       [VMEM]
    nei_ref:  (B, S, D)     sampled-neighbor features             [VMEM]
    w_ref:    (1, 1)        w_atom_r scalar                       [SMEM]
    afea_ref: (D, NA*P)     selected attr AFEs, col-concatenated  [VMEM]
    afer_ref: (D, NR*P)     selected rela AFEs, col-concatenated  [VMEM]
    wcls_ref: (F, C)        classifier_simp_atom weight (in, out) [VMEM]
    bcls_ref: (1, C)        classifier bias                       [VMEM]
    y_ref:    (B, C)        one-hot labels                        [VMEM]
    atom_ref: (B, F)        flat normalized atom embeddings (out) [VMEM]
    preds_ref:(B, C)        softmax(logits)                 (out) [VMEM]
    loss_ref: (1, 1)        mean cross-entropy on preds     (out) [SMEM]
    """
    B, D = c_ref.shape
    S = nei_ref.shape[1]
    P = DIM_PROTO
    NA = afea_ref.shape[1] // P
    NR = afer_ref.shape[1] // P

    w = w_ref[0, 0]
    c = c_ref[...]                                   # (B, D)
    nei = nei_ref[...]                               # (B, S, D)

    # --- (1) all attribute embeddings in ONE MXU pass: (B,D)@(D,NA*P) ---
    ea = jnp.dot(c, afea_ref[...], preferred_element_type=jnp.float32)   # (B, NA*P)

    # --- (2) pair features, vectorized over the whole (B,S,D) block ---
    pair = w * c[:, None, :] + (1.0 - w) * nei                           # (B, S, D)

    # --- (3) all relation embeddings in ONE MXU pass: (B*S,D)@(D,NR*P) ---
    er = jnp.dot(pair.reshape(B * S, D), afer_ref[...],
                 preferred_element_type=jnp.float32)                     # (B*S, NR*P)

    # --- (4) assemble (B, N_ATOMS, P) in the exact torch cat order:
    #         [attr_0 .. attr_{NA-1}, rela_0(s=0..S-1), rela_1(...), ...]
    attr3 = ea.reshape(B, NA, P)                                         # (B, NA, P)
    rela3 = jnp.concatenate(
        [er[:, r * P:(r + 1) * P].reshape(B, S, P) for r in range(NR)],
        axis=1)                                                          # (B, NR*S, P)
    atoms = jnp.concatenate([attr3, rela3], axis=1)                      # (B, N_ATOMS, P)

    # --- (5) F.normalize(p=2, dim=-1, eps=1e-12) == x / max(||x||, eps)
    #         rsqrt(max(sumsq, eps^2)) is mathematically identical and goes
    #         to the (otherwise idle) EUP slot.
    ssq = jnp.sum(atoms * atoms, axis=-1, keepdims=True)
    atoms_n = atoms * jax.lax.rsqrt(jnp.maximum(ssq, 1e-24))

    # --- (6) single lane-dense store of the flat (B, F) slab ---
    atom_flat = atoms_n.reshape(B, atoms.shape[1] * P)                   # (B, F)
    atom_ref[...] = atom_flat

    # --- (7) classifier_simp_atom + softmax -> preds_emb ---
    logits = jnp.dot(atom_flat, wcls_ref[...],
                     preferred_element_type=jnp.float32) + bcls_ref[...]  # (B, C)
    m1 = jnp.max(logits, axis=-1, keepdims=True)
    e1 = jnp.exp(logits - m1)
    probs = e1 * pl.reciprocal(jnp.sum(e1, axis=-1, keepdims=True), approx=True)
    preds_ref[...] = probs

    # --- (8) PyTorch CrossEntropyLoss applied to the already-softmaxed preds
    #         (log_softmax of probs), reproducing the reference double-softmax.
    m2 = jnp.max(probs, axis=-1, keepdims=True)
    lse = jnp.log(jnp.sum(jnp.exp(probs - m2), axis=-1, keepdims=True)) + m2  # (B,1)
    picked = jnp.sum(probs * y_ref[...], axis=-1, keepdims=True)              # (B,1)
    per_ex = lse - picked                                                      # (B,1)
    loss11 = jnp.sum(per_ex, axis=0, keepdims=True) * (1.0 / B)                # (1,1)
    loss_ref[0, 0] = loss11[0, 0]


# ------------------------------ pallas_call wrapper ---------------------------
def pallas_hcpn_fused(c_feats, nei_feats, w_atom_r, afe_a_cat, afe_r_cat,
                      w_cls, b_cls, y_onehot):
    B = c_feats.shape[0]
    w_arr = jnp.full((1, 1), w_atom_r, dtype=jnp.float32)
    vmem = pl.BlockSpec(memory_space=pltpu.MemorySpace.VMEM)
    smem = pl.BlockSpec(memory_space=pltpu.MemorySpace.SMEM)
    atom_flat, preds, loss = pl.pallas_call(
        hcpn_fused_kernel,
        out_shape=(jax.ShapeDtypeStruct((B, ATOM_FLT), jnp.float32),
                   jax.ShapeDtypeStruct((B, NUM_CLASS), jnp.float32),
                   jax.ShapeDtypeStruct((1, 1), jnp.float32)),
        in_specs=[vmem, vmem, smem, vmem, vmem, vmem, vmem, vmem],
        out_specs=(vmem, vmem, smem),
    )(c_feats, nei_feats, w_arr, afe_a_cat, afe_r_cat, w_cls, b_cls, y_onehot)
    return atom_flat, preds, loss[0, 0]


# ------------------------------ parameters & forward ---------------------------
def init_params(key):
    ks = jax.random.split(key, 4)
    bound_afe = float(np.sqrt(1.0 / DATA_DIM))
    afe_attr = jax.random.uniform(ks[0], (N_AFE_A_ALLOC, DATA_DIM, DIM_PROTO),
                                  minval=-bound_afe, maxval=bound_afe,
                                  dtype=jnp.float32)
    afe_rela = jax.random.uniform(ks[1], (N_AFE_R_ALLOC, DATA_DIM, DIM_PROTO),
                                  minval=-bound_afe, maxval=bound_afe,
                                  dtype=jnp.float32)
    # classifier_simp_atom: Linear(ATOM_FLT, NUM_CLASS); stored as (in, out)
    bnd = float(1.0 / np.sqrt(ATOM_FLT))
    w_cls = jax.random.uniform(ks[2], (ATOM_FLT, NUM_CLASS),
                               minval=-bnd, maxval=bnd, dtype=jnp.float32)
    b_cls = jax.random.uniform(ks[3], (1, NUM_CLASS),
                               minval=-bnd, maxval=bnd, dtype=jnp.float32)
    return {"afe_attr": afe_attr, "afe_rela": afe_rela,
            "w_cls_atom": w_cls, "b_cls_atom": b_cls}


def hcpn_forward(params, features, c_ids, nei_ids, labels_onehot):
    # --- glue: gathers / reshapes (no heavy compute) ---
    c_feats = features[c_ids]                                        # (B, D)
    nei_feats = features[nei_ids].reshape(BATCH, SUM_NBS, DATA_DIM)  # (B, S, D)
    c_labels_1h = labels_onehot[c_ids].astype(jnp.float32)           # (B, C)
    # TODO(synk): at scaled sizes, fold these gathers into the kernel via
    # PrefetchScalarGridSpec + Element-style index_maps instead of XLA gather.

    # deterministic "first unused ids" AFE selection (torch override path)
    afe_a_sel = [params["afe_attr"][i] for i in range(N_AFE_A_SELECT)]
    afe_r_sel = [params["afe_rela"][i] for i in range(N_AFE_R_SELECT)]
    afe_a_cat = jnp.concatenate(afe_a_sel, axis=1)   # (D, NA*P)
    afe_r_cat = jnp.concatenate(afe_r_sel, axis=1)   # (D, NR*P)

    # --- Pallas fused hot path (single launch) ---
    atom_flat, preds_emb, loss_cls_emb = pallas_hcpn_fused(
        c_feats, nei_feats, W_ATOM_R, afe_a_cat, afe_r_cat,
        params["w_cls_atom"], params["b_cls_atom"], c_labels_1h)
    atom_embs_n = atom_flat.reshape(BATCH, N_ATOMS, DIM_PROTO)

    # training & not est_proto branch of the reference: these are literal zeros
    loss_cls_atom   = jnp.float32(0.0)
    loss_cls_aoc_ao = jnp.float32(0.0)   # 10 * loss_cls_aoc + loss_cls_ao
    loss_emb_dis    = jnp.float32(0.0)
    # AFE_*_id_rec have length 2 at __init__ => diversity-reg loops are empty
    diver_reg       = jnp.float32(0.0)

    losses = [loss_cls_emb, loss_cls_atom, loss_cls_aoc_ao, loss_emb_dis, diver_reg]
    # TODO(synk): preds_atom / preds_ao / preds_aoc / associated_aocs require
    # utils.Component_prototypes.update (external prototype memory) — not reproduced.
    return losses, preds_emb, atom_embs_n


# ----------------------------------- main --------------------------------------
if __name__ == "__main__":
    key = jax.random.PRNGKey(0)
    k_param, k_feat, k_lab = jax.random.split(key, 3)

    params = init_params(k_param)
    features = jax.random.normal(k_feat, (N_NODES, DATA_DIM), dtype=jnp.float32)

    # deterministic one-hot labels
    label_ids = jax.random.randint(k_lab, (N_NODES,), 0, NUM_CLASS)
    labels_onehot = jax.nn.one_hot(label_ids, NUM_CLASS, dtype=jnp.float32)

    # batch ids + deterministic neighbor pick (replaces utils.lil_sample)
    c_ids = jnp.arange(BATCH, dtype=jnp.int32)
    nei_ids = jnp.stack(
        [(c_ids + k + 1) % N_NODES for k in range(SUM_NBS)], axis=1
    ).reshape(-1)                                                    # (B*S,)

    fwd = jax.jit(hcpn_forward)
    losses, preds_emb, atom_embs_n = fwd(params, features, c_ids, nei_ids,
                                         labels_onehot)
    jax.block_until_ready((losses, preds_emb, atom_embs_n))
    print("KERNEL_OK")
</pallas_src>

<mosaic_0001>
module attributes {stable_mosaic.version = 11 : i64} {
  func.func @hcpn_fused_kernel(%arg0: memref<8x32xf32, #tpu.memory_space<vmem>>, %arg1: memref<8x3x32xf32, #tpu.memory_space<vmem>>, %arg2: memref<1x1xf32, #tpu.memory_space<smem>>, %arg3: memref<32x32xf32, #tpu.memory_space<vmem>>, %arg4: memref<32x16xf32, #tpu.memory_space<vmem>>, %arg5: memref<80x4xf32, #tpu.memory_space<vmem>>, %arg6: memref<1x4xf32, #tpu.memory_space<vmem>>, %arg7: memref<8x4xf32, #tpu.memory_space<vmem>>, %arg8: memref<8x80xf32, #tpu.memory_space<vmem>>, %arg9: memref<8x4xf32, #tpu.memory_space<vmem>>, %arg10: memref<1x1xf32, #tpu.memory_space<smem>>) attributes {dimension_semantics = [], scalar_prefetch = 0 : i64, scratch_operands = 0 : i64, tpu.core_type = #tpu.core_type<tc>} {
    %c0 = arith.constant 0 : index
    %c0_0 = arith.constant 0 : index
    %0 = memref.load %arg2[%c0, %c0_0] : memref<1x1xf32, #tpu.memory_space<smem>>
    %c0_1 = arith.constant 0 : index
    %c0_2 = arith.constant 0 : index
    %1 = vector.load %arg0[%c0_1, %c0_2] : memref<8x32xf32, #tpu.memory_space<vmem>>, vector<8x32xf32>
    %c0_3 = arith.constant 0 : index
    %c0_4 = arith.constant 0 : index
    %c0_5 = arith.constant 0 : index
    %2 = vector.load %arg1[%c0_3, %c0_4, %c0_5] : memref<8x3x32xf32, #tpu.memory_space<vmem>>, vector<8x3x32xf32>
    %c0_6 = arith.constant 0 : index
    %c0_7 = arith.constant 0 : index
    %3 = vector.load %arg3[%c0_6, %c0_7] : memref<32x32xf32, #tpu.memory_space<vmem>>, vector<32x32xf32>
    %cst = arith.constant dense<0.000000e+00> : vector<8x32xf32>
    %4 = tpu.matmul %1, %3, %cst {dimension_numbers = #tpu.dot_dimension_numbers<[1], [0], [0], [1], [0, 0, 1, 1], [], []>} : vector<8x32xf32>, vector<32x32xf32>, vector<8x32xf32> -> vector<8x32xf32>
    %5 = vector.shape_cast %1 : vector<8x32xf32> to vector<8x1x32xf32>
    %6 = vector.broadcast %0 : f32 to vector<8x1x32xf32>
    %7 = arith.mulf %6, %5 : vector<8x1x32xf32>
    %cst_8 = arith.constant 1.000000e+00 : f32
    %8 = arith.subf %cst_8, %0 : f32
    %9 = vector.broadcast %8 : f32 to vector<8x3x32xf32>
    %10 = arith.mulf %9, %2 : vector<8x3x32xf32>
    %11 = vector.broadcast %7 : vector<8x1x32xf32> to vector<8x3x32xf32>
    %12 = arith.addf %11, %10 : vector<8x3x32xf32>
    %13 = vector.shape_cast %12 : vector<8x3x32xf32> to vector<24x32xf32>
    %c0_9 = arith.constant 0 : index
    %c0_10 = arith.constant 0 : index
    %14 = vector.load %arg4[%c0_9, %c0_10] : memref<32x16xf32, #tpu.memory_space<vmem>>, vector<32x16xf32>
    %cst_11 = arith.constant dense<0.000000e+00> : vector<24x16xf32>
    %15 = tpu.matmul %13, %14, %cst_11 {dimension_numbers = #tpu.dot_dimension_numbers<[1], [0], [0], [1], [0, 0, 1, 1], [], []>} : vector<24x32xf32>, vector<32x16xf32>, vector<24x16xf32> -> vector<24x16xf32>
    %16 = vector.shape_cast %4 : vector<8x32xf32> to vector<8x2x16xf32>
    %17 = vector.shape_cast %15 : vector<24x16xf32> to vector<8x3x16xf32>
    %18 = tpu.concatenate %16, %17 in 1 : vector<8x2x16xf32>, vector<8x3x16xf32> -> vector<8x5x16xf32>
    %19 = arith.mulf %18, %18 : vector<8x5x16xf32>
    %cst_12 = arith.constant dense<0.000000e+00> : vector<8x5xf32>
    %20 = vector.multi_reduction <add>, %19, %cst_12 [2] : vector<8x5x16xf32> to vector<8x5xf32>
    %21 = vector.shape_cast %20 : vector<8x5xf32> to vector<8x5x1xf32>
    %cst_13 = arith.constant 1.000000e-24 : f32
    %22 = vector.broadcast %cst_13 : f32 to vector<8x5x1xf32>
    %23 = arith.maximumf %21, %22 : vector<8x5x1xf32>
    %24 = math.rsqrt %23 : vector<8x5x1xf32>
    %25 = vector.broadcast %24 : vector<8x5x1xf32> to vector<8x5x16xf32>
    %26 = arith.mulf %18, %25 : vector<8x5x16xf32>
    %27 = vector.shape_cast %26 : vector<8x5x16xf32> to vector<8x80xf32>
    %c0_14 = arith.constant 0 : index
    %c0_15 = arith.constant 0 : index
    %28 = vector.load %arg8[%c0_14, %c0_15] : memref<8x80xf32, #tpu.memory_space<vmem>>, vector<8x80xf32>
    tpu.vector_store %arg8[%c0_14, %c0_15], %27 {strides = array<i32>} : memref<8x80xf32, #tpu.memory_space<vmem>>, vector<8x80xf32>,
    %c0_16 = arith.constant 0 : index
    %c0_17 = arith.constant 0 : index
    %29 = vector.load %arg5[%c0_16, %c0_17] : memref<80x4xf32, #tpu.memory_space<vmem>>, vector<80x4xf32>
    %cst_18 = arith.constant dense<0.000000e+00> : vector<8x4xf32>
    %30 = tpu.matmul %27, %29, %cst_18 {dimension_numbers = #tpu.dot_dimension_numbers<[1], [0], [0], [1], [0, 0, 1, 1], [], []>} : vector<8x80xf32>, vector<80x4xf32>, vector<8x4xf32> -> vector<8x4xf32>
    %c0_19 = arith.constant 0 : index
    %c0_20 = arith.constant 0 : index
    %31 = vector.load %arg6[%c0_19, %c0_20] : memref<1x4xf32, #tpu.memory_space<vmem>>, vector<1x4xf32>
    %32 = vector.broadcast %31 : vector<1x4xf32> to vector<8x4xf32>
    %33 = arith.addf %30, %32 : vector<8x4xf32>
    %cst_21 = arith.constant dense<0xFF800000> : vector<8xf32>
    %34 = vector.multi_reduction <maximumf>, %33, %cst_21 [1] : vector<8x4xf32> to vector<8xf32>
    %35 = vector.shape_cast %34 : vector<8xf32> to vector<8x1xf32>
    %36 = vector.broadcast %35 : vector<8x1xf32> to vector<8x4xf32>
    %37 = arith.subf %33, %36 : vector<8x4xf32>
    %38 = math.exp %37 : vector<8x4xf32>
    %cst_22 = arith.constant dense<0.000000e+00> : vector<8xf32>
    %39 = vector.multi_reduction <add>, %38, %cst_22 [1] : vector<8x4xf32> to vector<8xf32>
    %40 = vector.shape_cast %39 : vector<8xf32> to vector<8x1xf32>
    %41 = tpu.reciprocal %40 {approx = true} : vector<8x1xf32> -> vector<8x1xf32>
    %42 = vector.broadcast %41 : vector<8x1xf32> to vector<8x4xf32>
    %43 = arith.mulf %38, %42 : vector<8x4xf32>
    %c0_23 = arith.constant 0 : index
    %c0_24 = arith.constant 0 : index
    %44 = vector.load %arg9[%c0_23, %c0_24] : memref<8x4xf32, #tpu.memory_space<vmem>>, vector<8x4xf32>
    tpu.vector_store %arg9[%c0_23, %c0_24], %43 {strides = array<i32>} : memref<8x4xf32, #tpu.memory_space<vmem>>, vector<8x4xf32>,
    %cst_25 = arith.constant dense<0xFF800000> : vector<8xf32>
    %45 = vector.multi_reduction <maximumf>, %43, %cst_25 [1] : vector<8x4xf32> to vector<8xf32>
    %46 = vector.shape_cast %45 : vector<8xf32> to vector<8x1xf32>
    %47 = vector.broadcast %46 : vector<8x1xf32> to vector<8x4xf32>
    %48 = arith.subf %43, %47 : vector<8x4xf32>
    %49 = math.exp %48 : vector<8x4xf32>
    %cst_26 = arith.constant dense<0.000000e+00> : vector<8xf32>
    %50 = vector.multi_reduction <add>, %49, %cst_26 [1] : vector<8x4xf32> to vector<8xf32>
    %51 = vector.shape_cast %50 : vector<8xf32> to vector<8x1xf32>
    %52 = math.log %51 : vector<8x1xf32>
    %53 = arith.addf %52, %46 : vector<8x1xf32>
    %c0_27 = arith.constant 0 : index
    %c0_28 = arith.constant 0 : index
    %54 = vector.load %arg7[%c0_27, %c0_28] : memref<8x4xf32, #tpu.memory_space<vmem>>, vector<8x4xf32>
    %55 = arith.mulf %43, %54 : vector<8x4xf32>
    %cst_29 = arith.constant dense<0.000000e+00> : vector<8xf32>
    %56 = vector.multi_reduction <add>, %55, %cst_29 [1] : vector<8x4xf32> to vector<8xf32>
    %57 = vector.shape_cast %56 : vector<8xf32> to vector<8x1xf32>
    %58 = arith.subf %53, %57 : vector<8x1xf32>
    %cst_30 = arith.constant dense<0.000000e+00> : vector<1xf32>
    %59 = vector.multi_reduction <add>, %58, %cst_30 [0] : vector<8x1xf32> to vector<1xf32>
    %60 = vector.shape_cast %59 : vector<1xf32> to vector<1x1xf32>
    %cst_31 = arith.constant 1.250000e-01 : f32
    %61 = vector.broadcast %cst_31 : f32 to vector<1x1xf32>
    %62 = arith.mulf %60, %61 : vector<1x1xf32>
    %63 = vector.extract %62[0, 0] : f32 from vector<1x1xf32>
    %c0_32 = arith.constant 0 : index
    %c0_33 = arith.constant 0 : index
    %64 = memref.load %arg10[%c0_32, %c0_33] : memref<1x1xf32, #tpu.memory_space<smem>>
    memref.store %63, %arg10[%c0_32, %c0_33] : memref<1x1xf32, #tpu.memory_space<smem>>
    return
  }
}

</mosaic_0001>

<bundles_post_ra>
// kernel: hcpn_forward.1
= control target key start
LH: loop header
LB: loop body
LE: loop exit
PB: predicated region body
PF: predicated region fallthrough
CT: control target
= control target key end

     0   :  { %vm48_vm0 = vcmask 261120   ;;  %s1190_s0 = inlined_call_operand.vmem [shape: f32[8,32], index: 0, kind: input, shape index: {}]   ;;  %s1191_s1 = inlined_call_operand.vmem [shape: f32[8,3,32], index: 1, kind: input, shape index: {}]   ;;  %s1192_s2 = inlined_call_operand.<no memory space> [shape: f32[1,1], index: 2, kind: input, shape index: {}]   ;;  %s1193_s3 = inlined_call_operand.vmem [shape: f32[32,32], index: 3, kind: input, shape index: {}]   ;;  %s1194_s4 = inlined_call_operand.vmem [shape: f32[32,16], index: 4, kind: input, shape index: {}]   ;;  %s1195_s5 = inlined_call_operand.vmem [shape: f32[80,4], index: 5, kind: input, shape index: {}]   ;;  %s1196_s6 = inlined_call_operand.vmem [shape: f32[1,4], index: 6, kind: input, shape index: {}]   ;;  %s1197_s7 = inlined_call_operand.vmem [shape: f32[8,4], index: 7, kind: input, shape index: {}]   ;;  %s1198_s8 = inlined_call_operand.vmem [shape: f32[8,80], index: 8, kind: output, shape index: {0}]   ;;  %s1199_s9 = inlined_call_operand.vmem [shape: f32[8,4], index: 9, kind: output, shape index: {1}]   ;;  %s1200_s10 = inlined_call_operand.hbm [shape: f32[1,1], index: 10, kind: output, shape index: {2}]  }
   0x1   :  { %v47_v0 = vld [vmem:[%s1193_s3 + $0x18] sm:$0xff]  ;;  %v46_v1 = vld [vmem:[%s1193_s3 + $0x10] sm:$0xff]  ;;  %s95_s19 = ssub.f32 1.0, %s1192_s2  ;;  %v846_v2 = vstv %s1192_s2  ;;  %v45_v3 = vld [vmem:[%s1193_s3 + $0x8] sm:$0xff] }
   0x2   :  { %64 = vmatpush.msra.mxu0 %v47_v0  ;;  %v854_v4 = vld [vmem:[%s1190_s0] sm:$0xff]  ;;  %v38_v9 = vld [vmem:[%s1191_s1 + $0x8] sm:$0x7] }
   0x3   :  { %v36_v5 = vld [vmem:[%s1191_s1] sm:$0x7]  ;;  %v37_v6 = vld [vmem:[%s1191_s1 + $0x4] sm:$0x7]  ;;  %v862_v7 = vstv %s95_s19  ;;  %v72_v10 = vrot.slane %v854_v4, 1  ;;  %v73_v11 = vrot.slane %v854_v4, 2  ;;  %v87_v12 = vmul.f32 %v846_v2, %v854_v4 }
   0x4   :  { %65 = vmatpush.msra.mxu0 %v46_v1  ;;  %v44_v8 = vld [vmem:[%s1193_s3] sm:$0xff]  ;;  %v97_v15 = vmul.f32 %v862_v7, %v36_v5  ;;  %v98_v16 = vmul.f32 %v862_v7, %v37_v6 }
   0x5   :  { %v88_v13 = vmul.f32 %v846_v2, %v72_v10  ;;  %v89_v14 = vmul.f32 %v846_v2, %v73_v11 }
   0x6   :  { %66 = vmatpush.msra.mxu0 %v45_v3 }
   0x7   :  { %17 = vsyncpa [#allocation4], 0  ;;  %v99_v17 = vmul.f32 %v862_v7, %v38_v9  ;;  %v113_v18 = vperm.slane %v87_v12, 0  ;;  %v114_v19 = vperm.slane %v88_v13, 0  ;;  %v74_v20 = vrot.slane %v854_v4, 3  ;;  %v164_v25 = vld [vmem:[%s1194_s4 + $0x18] sm:$0xff] }
   0x8   :  { %67 = vmatpush.msra.mxu0 %v44_v8  ;;  %v115_v21 = vperm.slane %v89_v14, 0  ;;  %v75_v26 = vrot.slane %v854_v4, 4  ;;  %217 = vmatpush.msra.mxu1 %v164_v25  ;;  %v39_v32 = vld [vmem:[%s1191_s1 + $0xc] sm:$0x7]  ;;  %v163_v35 = vld [vmem:[%s1194_s4 + $0x10] sm:$0xff]  ;;  %v76_v40 = vrot.slane %v854_v4, 5 }
   0x9   :  { %713 = vmatmul.msk.f32.vlgmr.msra.gmra.mxu0 %vm48_vm0, %v854_v4  ;;  %v129_v22 = vadd.f32 %v113_v18, %v97_v15  ;;  %v130_v23 = vadd.f32 %v114_v19, %v98_v16  ;;  %718 = vmatpush.msra.mxu3 %v164_v25  ;;  %v90_v29 = vmul.f32 %v846_v2, %v74_v20  ;;  %v162_v36 = vld [vmem:[%s1194_s4 + $0x8] sm:$0xff]  ;;  %v40_v37 = vld [vmem:[%s1191_s1 + $0x10] sm:$0x7]  ;;  %v161_v41 = vld [vmem:[%s1194_s4] sm:$0xff]  ;;  %v77_v49 = vrot.slane %v854_v4, 6  ;;  %s774_s28 = smov 64  }
   0xa   :  { %v131_v24 = vadd.f32 %v115_v21, %v99_v17  ;;  %v91_v34 = vmul.f32 %v846_v2, %v75_v26  ;;  %v100_v38 = vmul.f32 %v862_v7, %v39_v32  ;;  %218 = vmatpush.msra.mxu1 %v163_v35  ;;  %v101_v42 = vmul.f32 %v862_v7, %v40_v37  ;;  %v41_v46 = vld [vmem:[%s1191_s1 + $0x14] sm:$0x7]  ;;  %v42_v59 = vld [vmem:[%s1191_s1 + $0x18] sm:$0x7]  ;;  %v43_v62 = vld [vmem:[%s1191_s1 + $0x1c] sm:$0x7] }
   0xb   :  { %v145_v27 = vrot.slane %v129_v22, 1  ;;  %v146_v28 = vrot.slane %v129_v22, 2  ;;  %165 = vst [vmem:[#allocation1] ss:$9 sm:$0xff] %v129_v22  ;;  %v147_v30 = vrot.slane %v130_v23, 1  ;;  %v148_v31 = vrot.slane %v130_v23, 2  ;;  %719 = vmatpush.msra.mxu3 %v163_v35 }
   0xc   :  { %171 = vst [vmem:[#allocation1 + $0x3] ss:$9 sm:$0xff] %v130_v23  ;;  %v149_v33 = vrot.slane %v131_v24, 1  ;;  %v116_v39 = vperm.slane %v90_v29, 0  ;;  %219 = vmatpush.msra.mxu1 %v162_v36  ;;  %v117_v43 = vperm.slane %v91_v34, 0  ;;  %v92_v45 = vmul.f32 %v846_v2, %v76_v40  ;;  %s771_s1 = smov 112  }
   0xd   :  { %167 = vst [vmem:[#allocation1 + $0x1] ss:$9 sm:$0xff] %v145_v27  ;;  %720 = vmatpush.msra.mxu3 %v162_v36  ;;  %v150_v47 = vrot.slane %v131_v24, 2  ;;  %v102_v51 = vmul.f32 %v862_v7, %v41_v46  ;;  %v78_v55 = vrot.slane %v854_v4, 7  ;;  %v93_v57 = vmul.f32 %v846_v2, %v77_v49  ;;  %s775_s29 = smov 32   ;;  %s776_s2 = smov 16  }
   0xe   :  { %169 = vst [vmem:[#allocation1 + $0x2] ss:$9 sm:$0xff] %v146_v28  ;;  %v132_v44 = vadd.f32 %v116_v39, %v100_v38  ;;  %220 = vmatpush.msra.mxu1 %v161_v41  ;;  %v133_v48 = vadd.f32 %v117_v43, %v101_v42  ;;  %v118_v52 = vperm.slane %v92_v45, 0  ;;  %v103_v63 = vmul.f32 %v862_v7, %v42_v59  ;;  %s777_s30 = smov 48   ;;  %s699_s11 = sshll.u32 %s1200_s10, 4  ;;  %s700_s11 = int_to_ptr.hbm [resolvable:$true] %s699_s11 }
   0xf   :  { %173 = vst [vmem:[#allocation1 + $0x4] ss:$9 sm:$0xff] %v147_v30  ;;  %721 = vmatpush.msra.mxu3 %v161_v41  ;;  %v94_v61 = vmul.f32 %v846_v2, %v78_v55  ;;  %v119_v0 = vperm.slane %v93_v57, 0  ;;  %v104_v1 = vmul.f32 %v862_v7, %v43_v62  ;;  %v772_v45 = vmov 1983009808   ;;  %s778_s0 = smov [#allocation3]  }
  0x10   :  { %175 = vst [vmem:[#allocation1 + $0x5] ss:$9 sm:$0xff] %v148_v31  ;;  %v151_v50 = vrot.slane %v132_v44, 1  ;;  %v152_v53 = vrot.slane %v132_v44, 2  ;;  %v153_v56 = vrot.slane %v133_v48, 1  ;;  %v154_v58 = vrot.slane %v133_v48, 2 }
  0x11   :  { %177 = vst [vmem:[#allocation1 + $0x6] ss:$9 sm:$0xff] %v131_v24  ;;  %v134_v60 = vadd.f32 %v118_v52, %v102_v51  ;;  %v120_v3 = vperm.slane %v94_v61, 0  ;;  %v135_v4 = vadd.f32 %v119_v0, %v103_v63  ;;  %v239_v46 = vunpack.c.l.s4 %v772_v45 }
  0x12   :  { %179 = vst [vmem:[#allocation1 + $0x7] ss:$9 sm:$0xff] %v149_v33  ;;  %vm236_vm1 = vcmask 1047556   ;;  %v773_v49 = vmov 1934713408   ;;  %vm355_vm2 = vcmask 1041408  }
  0x13   :  { %v155_v5 = vrot.slane %v134_v60, 1  ;;  %v156_v6 = vrot.slane %v134_v60, 2  ;;  %v136_v8 = vadd.f32 %v120_v3, %v104_v1  ;;  %v157_v9 = vrot.slane %v135_v4, 1 }
  0x14   :  { %v158_v2 = vrot.slane %v135_v4, 2  ;;  %vm372_vm3 = vcmask 126976  }
  0x15   :  { %v159_v11 = vrot.slane %v136_v8, 1  ;;  %v160_v12 = vrot.slane %v136_v8, 2 }
  0x19   :  { %v180_v54 = vld [vmem:[#allocation1] sm:$0xff] }
  0x1a   :  { %181 = vst [vmem:[#allocation1] ss:$9 sm:$0xff] %v150_v47  ;;  %714 = vmatmul.msk.f32.vlgmr.msra.gmra.mxu1 %vm48_vm0, %v180_v54  ;;  %v937_v47 = vunpack.c.0.s8 %v239_v46 }
  0x1b   :  { %182 = vst [vmem:[#allocation1 + $0x1] ss:$9 sm:$0xff] %v132_v44 }
  0x1c   :  { %183 = vst [vmem:[#allocation1 + $0x2] ss:$9 sm:$0xff] %v151_v50  ;;  %v261_v50 = vunpack.c.l.s4 %v773_v49 }
  0x1d   :  { %184 = vst [vmem:[#allocation1 + $0x3] ss:$9 sm:$0xff] %v152_v53 }
  0x1e   :  { %185 = vst [vmem:[#allocation1 + $0x4] ss:$9 sm:$0xff] %v133_v48  ;;  %v943_v53 = vunpack.c.0.s8 %v261_v50 }
  0x1f   :  { %186 = vst [vmem:[#allocation1 + $0x5] ss:$9 sm:$0xff] %v153_v56 }
  0x20   :  { %187 = vst [vmem:[#allocation1 + $0x6] ss:$9 sm:$0xff] %v154_v58 }
  0x21   :  { %188 = vst [vmem:[#allocation1 + $0x7] ss:$9 sm:$0xff] %v134_v60 }
  0x28   :  { %v189_v10 = vld [vmem:[#allocation1] sm:$0xff] }
  0x29   :  { %190 = vst [vmem:[#allocation1] ss:$9 sm:$0xff] %v155_v5  ;;  %715 = vmatmul.msk.f32.vlgmr.msra.gmra.mxu3 %vm48_vm0, %v189_v10 }
  0x2a   :  { %191 = vst [vmem:[#allocation1 + $0x1] ss:$9 sm:$0xff] %v156_v6 }
  0x2b   :  { %192 = vst [vmem:[#allocation1 + $0x2] ss:$9 sm:$0xff] %v135_v4 }
  0x2c   :  { %193 = vst [vmem:[#allocation1 + $0x3] ss:$9 sm:$0xff] %v157_v9 }
  0x2d   :  { %194 = vst [vmem:[#allocation1 + $0x4] ss:$9 sm:$0xff] %v158_v2 }
  0x2e   :  { %195 = vst [vmem:[#allocation1 + $0x5] ss:$9 sm:$0xff] %v136_v8 }
  0x2f   :  { %196 = vst [vmem:[#allocation1 + $0x6] ss:$9 sm:$0xff] %v159_v11 }
  0x30   :  { %197 = vst [vmem:[#allocation1 + $0x7] ss:$9 sm:$0xff] %v160_v12 }
  0x37   :  { %v198_v7 = vld [vmem:[#allocation1] sm:$0xff] }
  0x38   :  { %716 = vmatmul.msk.f32.gmra.mxu3 %vm48_vm0, %v198_v7 }
  0x86   :  { %v926_v13 = vpop.f32.mrf.mxu0 }
  0x87   :  { %232 = vrot.lane.b32.xlu0 %v926_v13, %s771_s1  ;;  %v235_v48 = vrot.slane %v926_v13, 4  ;;  %v241_v51 = vperm.slane %v926_v13, %v937_v47 }
  0x89   :  { %v237_v52 = vsel %vm236_vm1, 0.0, %v235_v48  ;;  %v258_v56 = vrot.slane %v241_v51, 4 }
  0x8a   :  { %v245_v55 = vperm.slane %v237_v52, %v937_v47 }
  0x8c   :  { %v270_v0 = vrot.slane %v245_v55, 4 }
  0x97   :  { %v222_v14 = vpop.f32.mrf.mxu1 }
  0x98   :  { %v291_v15 = vrot.slane %v222_v14, 1  ;;  %v292_v16 = vrot.slane %v222_v14, 2  ;;  %313 = vst [vmem:[#allocation1 + $0x2] ss:$9 sm:$0xff] %v222_v14  ;;  %v293_v17 = vrot.slane %v222_v14, 3  ;;  %v294_v18 = vrot.slane %v222_v14, 4 }
  0x99   :  { %v295_v19 = vrot.slane %v222_v14, 5  ;;  %v296_v21 = vrot.slane %v222_v14, 6  ;;  %v297_v22 = vrot.slane %v222_v14, 7 }
  0x9a   :  { %315 = vst [vmem:[#allocation1 + $0x3] ss:$9 sm:$0xff] %v291_v15 }
  0x9b   :  { %317 = vst [vmem:[#allocation1 + $0x4] ss:$9 sm:$0xff] %v292_v16 }
  0xa2   :  { %v929_v20 = vld [vmem:[#allocation1] sm:$0xff] }
  0xa3   :  { %319 = vst [vmem:[#allocation1 + $0x2] ss:$9 sm:$0xff] %v293_v17 }
  0xa4   :  { %320 = vst [vmem:[#allocation1 + $0x3] ss:$9 sm:$0xff] %v294_v18 }
  0xa5   :  { %321 = vst [vmem:[#allocation1 + $0x4] ss:$9 sm:$0xff] %v295_v19 }
  0xac   :  { %v931_v23 = vld [vmem:[#allocation1] sm:$0xff]  ;;  %v225_v24 = vpop.f32.mrf.mxu3 }
  0xad   :  { %323 = vst [vmem:[#allocation1 + $0x2] ss:$9 sm:$0xff] %v296_v21  ;;  %v298_v25 = vrot.slane %v225_v24, 1  ;;  %v299_v26 = vrot.slane %v225_v24, 2  ;;  %v300_v27 = vrot.slane %v225_v24, 3  ;;  %v301_v29 = vrot.slane %v225_v24, 4 }
  0xae   :  { %324 = vst [vmem:[#allocation1 + $0x3] ss:$9 sm:$0xff] %v297_v22  ;;  %v302_v30 = vrot.slane %v225_v24, 5  ;;  %v303_v31 = vrot.slane %v225_v24, 6  ;;  %v304_v34 = vrot.slane %v225_v24, 7 }
  0xaf   :  { %325 = vst [vmem:[#allocation1 + $0x4] ss:$9 sm:$0xff] %v225_v24 }
  0xb6   :  { %v326_v28 = vld [vmem:[#allocation1] sm:$0xff] }
  0xb7   :  { %327 = vst [vmem:[#allocation1 + $0x2] ss:$9 sm:$0xff] %v298_v25 }
  0xb8   :  { %328 = vst [vmem:[#allocation1 + $0x3] ss:$9 sm:$0xff] %v299_v26 }
  0xb9   :  { %329 = vst [vmem:[#allocation1 + $0x4] ss:$9 sm:$0xff] %v300_v27 }
  0xbb   :  { %v228_v33 = vpop.f32.mrf.mxu3 }
  0xbc   :  { %v305_v35 = vrot.slane %v228_v33, 1  ;;  %v306_v37 = vrot.slane %v228_v33, 2  ;;  %v307_v38 = vrot.slane %v228_v33, 3  ;;  %v308_v39 = vrot.slane %v228_v33, 4 }
  0xbd   :  { %v309_v41 = vrot.slane %v228_v33, 5  ;;  %v310_v42 = vrot.slane %v228_v33, 6  ;;  %v311_v43 = vrot.slane %v228_v33, 7 }
  0xc0   :  { %v330_v32 = vld [vmem:[#allocation1] sm:$0xff] }
  0xc1   :  { %331 = vst [vmem:[#allocation1 + $0x2] ss:$9 sm:$0xff] %v301_v29 }
  0xc2   :  { %332 = vst [vmem:[#allocation1 + $0x3] ss:$9 sm:$0xff] %v302_v30 }
  0xc3   :  { %333 = vst [vmem:[#allocation1 + $0x4] ss:$9 sm:$0xff] %v303_v31 }
  0xca   :  { %v933_v36 = vld [vmem:[#allocation1] sm:$0xff] }
  0xcb   :  { %335 = vst [vmem:[#allocation1 + $0x2] ss:$9 sm:$0xff] %v304_v34 }
  0xcc   :  { %336 = vst [vmem:[#allocation1 + $0x3] ss:$9 sm:$0xff] %v228_v33 }
  0xcd   :  { %337 = vst [vmem:[#allocation1 + $0x4] ss:$9 sm:$0xff] %v305_v35 }
  0xd4   :  { %v935_v40 = vld [vmem:[#allocation1] sm:$0xff] }
  0xd5   :  { %339 = vst [vmem:[#allocation1 + $0x2] ss:$9 sm:$0xff] %v306_v37 }
  0xd6   :  { %340 = vst [vmem:[#allocation1 + $0x3] ss:$9 sm:$0xff] %v307_v38 }
  0xd7   :  { %341 = vst [vmem:[#allocation1 + $0x4] ss:$9 sm:$0xff] %v308_v39 }
  0xde   :  { %v342_v44 = vld [vmem:[#allocation1] sm:$0xff] }
  0xdf   :  { %343 = vst [vmem:[#allocation1 + $0x2] ss:$9 sm:$0xff] %v309_v41 }
  0xe0   :  { %344 = vst [vmem:[#allocation1 + $0x3] ss:$9 sm:$0xff] %v310_v42 }
  0xe1   :  { %345 = vst [vmem:[#allocation1 + $0x4] ss:$9 sm:$0xff] %v311_v43 }
  0xe8   :  { %v346_v26 = vld [vmem:[#allocation1] sm:$0xff] }
  0xf9   :  { %v233_v54 = vpop.permute.xlu0 %232 }
  0xfa   :  { %v246_v57 = vrot.slane %v233_v54, 4  ;;  %v251_v58 = vperm.slane %v233_v54, %v937_v47 }
  0xfc   :  { %v247_v59 = vsel %vm236_vm1, 0.0, %v246_v57  ;;  %v256_v60 = vrot.slane %v251_v58, 4  ;;  %v259_v61 = vsel %vm236_vm1, %v251_v58, %v258_v56 }
  0xfd   :  { %v255_v62 = vperm.slane %v247_v59, %v937_v47  ;;  %v267_v63 = vperm.slane %v259_v61, %v943_v53 }
  0xfe   :  { %v257_v1 = vsel %vm236_vm1, %v256_v60, %v241_v51 }
  0xff   :  { %v263_v3 = vperm.slane %v257_v1, %v943_v53  ;;  %v268_v4 = vrot.slane %v255_v62, 4  ;;  %v954_v5 = vsel %vm355_vm2, %v267_v63, %v326_v28  ;;  %v282_v6 = vrot.slane %v267_v63, 4 }
 0x100   :  { %v366_v8 = vmul.f32 %v954_v5, %v954_v5  ;;  %v271_v9 = vsel %vm236_vm1, %v255_v62, %v270_v0 }
 0x101   :  { %v283_v10 = vsel %vm236_vm1, 0.0, %v282_v6  ;;  %v279_v2 = vperm.slane %v271_v9, %v943_v53  ;;  %v280_v11 = vrot.slane %v263_v3, 4  ;;  %v269_v12 = vsel %vm236_vm1, %v268_v4, %v245_v55 }
 0x102   :  { %v379_v7 = vsel %vm372_vm3, %v366_v8, 0.0  ;;  %v964_v13 = vsel %vm355_vm2, %v283_v10, %v330_v32  ;;  %v275_v14 = vperm.slane %v269_v12, %v943_v53  ;;  %v1008_v39 = vsel %vm355_vm2, %v263_v3, %v929_v20 }
 0x103   :  { %380 = vadd.xlane.f32.xlu2 %v379_v7  ;;  %v367_v15 = vmul.f32 %v964_v13, %v964_v13  ;;  %v970_v16 = vsel %vm355_vm2, %v279_v2, %v342_v44  ;;  %v286_v17 = vrot.slane %v279_v2, 4  ;;  %v281_v19 = vsel %vm236_vm1, 0.0, %v280_v11 }
 0x104   :  { %v370_v18 = vmul.f32 %v970_v16, %v970_v16  ;;  %v284_v21 = vrot.slane %v275_v14, 4  ;;  %v977_v22 = vsel %vm355_vm2, %v275_v14, %v933_v36  ;;  %v989_v30 = vsel %vm355_vm2, %v281_v19, %v931_v23 }
 0x105   :  { %v382_v24 = vsel %vm372_vm3, %v367_v15, 0.0  ;;  %v287_v25 = vsel %vm236_vm1, 0.0, %v286_v17  ;;  %v365_v33 = vmul.f32 %v989_v30, %v989_v30  ;;  %v368_v37 = vmul.f32 %v977_v22, %v977_v22 }
 0x106   :  { %383 = vadd.xlane.f32.xlu0 %v382_v24  ;;  %v391_v27 = vsel %vm372_vm3, %v370_v18, 0.0  ;;  %v983_v28 = vsel %vm355_vm2, %v287_v25, %v346_v26  ;;  %v285_v31 = vsel %vm236_vm1, 0.0, %v284_v21 }
 0x107   :  { %392 = vadd.xlane.f32.xlu1 %v391_v27  ;;  %v371_v29 = vmul.f32 %v983_v28, %v983_v28  ;;  %v997_v34 = vsel %vm355_vm2, %v285_v31, %v935_v40  ;;  %v376_v35 = vsel %vm372_vm3, %v365_v33, 0.0  ;;  %v385_v38 = vsel %vm372_vm3, %v368_v37, 0.0 }
 0x108   :  { %v369_v36 = vmul.f32 %v997_v34, %v997_v34  ;;  %v364_v40 = vmul.f32 %v1008_v39, %v1008_v39 }
 0x109   :  { %v394_v32 = vsel %vm372_vm3, %v371_v29, 0.0 }
 0x10a   :  { %v388_v23 = vsel %vm372_vm3, %v369_v36, 0.0  ;;  %v373_v41 = vsel %vm372_vm3, %v364_v40, 0.0 }
 0x10b   :  { %395 = vadd.xlane.f32.xlu2 %v394_v32 }
 0x10f   :  { %377 = vadd.xlane.f32.xlu1 %v376_v35 }
 0x113   :  { %389 = vadd.xlane.f32.xlu2 %v388_v23 }
 0x117   :  { %386 = vadd.xlane.f32.xlu1 %v385_v38 }
 0x11f   :  { %374 = vadd.xlane.f32.xlu1 %v373_v41 }
 0x176   :  { %v381_v42 = vpop.xlane.xlu2 %380 }
 0x177   :  { %v1019_v48 = vmax.f32 %v381_v42, 1e-24 }
 0x179   :  { %v384_v43 = vpop.xlane.xlu0 %383 }
 0x17a   :  { %v1013_v44 = vmax.f32 %v384_v43, 1e-24  ;;  %v393_v45 = vpop.xlane.xlu1 %392 }
 0x17b   :  { %v1015_v46 = vmax.f32 %v393_v45, 1e-24 }
 0x17c   :  { %733 = vrsqrt.f32 %v1013_v44  ;;  %vm441_vm5 = vweird.f32 %v1013_v44 }
 0x17d   :  { %735 = vrsqrt.f32 %v1015_v46  ;;  %vm471_vm10 = vweird.f32 %v1015_v46 }
 0x17e   :  { %v396_v20 = vpop.xlane.xlu2 %395 }
 0x17f   :  { %v404_v49 = vmax.f32 %v396_v20, 1e-24 }
 0x181   :  { %737 = vrsqrt.f32 %v404_v49  ;;  %vm481_vm6 = vweird.f32 %v404_v49 }
 0x182   :  { %v1021_v50 = vpop.eup %733  ;;  %739 = vrsqrt.f32 %v1019_v48  ;;  %v378_v51 = vpop.xlane.xlu1 %377 }
 0x183   :  { %v1024_v52 = vpop.eup %735  ;;  %v398_v54 = vmax.f32 %v378_v51, 1e-24  ;;  %v436_v56 = vmul.f32 %v1021_v50, %v1013_v44  ;;  %vm442_vm7 = vweird.f32 %v1021_v50 }
 0x184   :  { %v466_v55 = vmul.f32 %v1024_v52, %v1015_v46  ;;  %vm472_vm8 = vweird.f32 %v1024_v52  ;;  %vm1064_vm12 = vmor %vm441_vm5, %vm442_vm7 }
 0x185   :  { %741 = vrsqrt.f32 %v398_v54  ;;  %v437_v63 = vmul.f32 %v1021_v50, %v436_v56  ;;  %vm1071_vm14 = vmor %vm471_vm10, %vm472_vm8  ;;  %vm421_vm15 = vweird.f32 %v398_v54 }
 0x186   :  { %v390_v57 = vpop.xlane.xlu2 %389  ;;  %v467_v61 = vmul.f32 %v1024_v52, %v466_v55 }
 0x187   :  { %v738_v58 = vpop.eup %737  ;;  %v402_v59 = vmax.f32 %v390_v57, 1e-24  ;;  %v438_v2 = vmul.f32 0.5, %v437_v63 }
 0x188   :  { %v1030_v60 = vpop.eup %739  ;;  %v476_v62 = vmul.f32 %v738_v58, %v404_v49  ;;  %v468_v8 = vmul.f32 0.5, %v467_v61  ;;  %vm482_vm4 = vweird.f32 %v738_v58 }
 0x189   :  { %743 = vrsqrt.f32 %v402_v59  ;;  %v426_v4 = vmul.f32 %v1030_v60, %v1019_v48  ;;  %v439_v21 = vsub.f32 1.5, %v438_v2  ;;  %vm1048_vm9 = vmor %vm481_vm6, %vm482_vm4  ;;  %vm461_vm3 = vweird.f32 %v402_v59 }
 0x18a   :  { %v477_v0 = vmul.f32 %v738_v58, %v476_v62  ;;  %v387_v1 = vpop.xlane.xlu1 %386  ;;  %v469_v15 = vsub.f32 1.5, %v468_v8  ;;  %vm432_vm6 = vweird.f32 %v1030_v60 }
 0x18b   :  { %v1034_v3 = vpop.eup %741  ;;  %v1038_v6 = vmax.f32 %v387_v1, 1e-24  ;;  %v427_v14 = vmul.f32 %v1030_v60, %v426_v4  ;;  %v440_v37 = vmul.f32 %v1021_v50, %v439_v21 }
 0x18c   :  { %v478_v9 = vmul.f32 0.5, %v477_v0  ;;  %v416_v10 = vmul.f32 %v1034_v3, %v398_v54  ;;  %v470_v33 = vmul.f32 %v1024_v52, %v469_v15  ;;  %vm422_vm11 = vweird.f32 %v1034_v3 }
 0x18d   :  { %745 = vrsqrt.f32 %v1038_v6  ;;  %v428_v29 = vmul.f32 0.5, %v427_v14  ;;  %vm1079_vm2 = vmor %vm421_vm15, %vm422_vm11  ;;  %v444_v55 = vsel %vm1064_vm12, %v1021_v50, %v440_v37  ;;  %vm451_vm7 = vweird.f32 %v1038_v6 }
 0x18e   :  { %v479_v11 = vsub.f32 1.5, %v478_v9  ;;  %v417_v12 = vmul.f32 %v1034_v3, %v416_v10  ;;  %v474_v44 = vsel %vm1071_vm14, %v1024_v52, %v470_v33  ;;  %v488_v63 = vmul.f32 %v444_v55, %v964_v13 }
 0x18f   :  { %v744_v7 = vpop.eup %743  ;;  %v429_v43 = vsub.f32 1.5, %v428_v29  ;;  %v491_v57 = vmul.f32 %v474_v44, %v970_v16  ;;  %vm606_vm14 = vcmask 392192   ;;  %vm608_vm15 = vcmask 523264  }
 0x190   :  { %v480_v17 = vmul.f32 %v738_v58, %v479_v11  ;;  %v418_v18 = vmul.f32 0.5, %v417_v12  ;;  %v456_v19 = vmul.f32 %v744_v7, %v402_v59  ;;  %vm462_vm13 = vweird.f32 %v744_v7 }
 0x191   :  { %vm463_vm4 = vmor %vm461_vm3, %vm462_vm13  ;;  %v430_v61 = vmul.f32 %v1030_v60, %v429_v43  ;;  %v505_v2 = vrot.slane %v488_v63, 4  ;;  %vm649_vm3 = vcmask 31744  }
 0x192   :  { %v419_v24 = vsub.f32 1.5, %v418_v18  ;;  %v457_v25 = vmul.f32 %v744_v7, %v456_v19  ;;  %v375_v26 = vpop.xlane.xlu1 %374  ;;  %v484_v35 = vsel %vm1048_vm9, %v738_v58, %v480_v17  ;;  %vm431_vm9 = vweird.f32 %v1019_v48 }
 0x193   :  { %v746_v27 = vpop.eup %745  ;;  %v1052_v32 = vmax.f32 %v375_v26, 1e-24  ;;  %v492_v46 = vmul.f32 %v484_v35, %v983_v28  ;;  %vm433_vm10 = vmor %vm431_vm9, %vm432_vm6 }
 0x194   :  { %v458_v36 = vmul.f32 0.5, %v457_v25  ;;  %v446_v23 = vmul.f32 %v746_v27, %v1038_v6  ;;  %v420_v40 = vmul.f32 %v1034_v3, %v419_v24  ;;  %vm452_vm5 = vweird.f32 %v746_v27 }
 0x195   :  { %747 = vrsqrt.f32 %v1052_v32  ;;  %v529_v58 = vrot.slane %v492_v46, 4  ;;  %vm453_vm8 = vmor %vm451_vm7, %vm452_vm5  ;;  %v517_v6 = vrot.slane %v491_v57, 4  ;;  %vm411_vm12 = vweird.f32 %v1052_v32 }
 0x196   :  { %v459_v41 = vsub.f32 1.5, %v458_v36  ;;  %v447_v42 = vmul.f32 %v746_v27, %v446_v23  ;;  %v424_v28 = vsel %vm1079_vm2, %v1034_v3, %v420_v40  ;;  %vm610_vm2 = vcmask 654336  }
 0x197   :  { %v486_v0 = vmul.f32 %v424_v28, %v989_v30  ;;  %v434_v30 = vsel %vm433_vm10, %v1030_v60, %v430_v61 }
 0x198   :  { %v460_v49 = vmul.f32 %v744_v7, %v459_v41  ;;  %v448_v51 = vmul.f32 0.5, %v447_v42  ;;  %v487_v17 = vmul.f32 %v434_v30, %v954_v5 }
 0x199   :  { %v507_v11 = vrot.slane %v486_v0, 4  ;;  %v506_v60 = vsel %vm236_vm1, %v505_v2, %v486_v0  ;;  %v619_v0 = vld [vmem:[%s1195_s5 + $0x38] sm:$0xff] }
 0x19a   :  { %v464_v54 = vsel %vm463_vm4, %v744_v7, %v460_v49  ;;  %v449_v56 = vsub.f32 1.5, %v448_v51  ;;  %v493_v5 = vrot.slane %v487_v17, 4 }
 0x19b   :  { %v748_v52 = vpop.eup %747  ;;  %v490_v59 = vmul.f32 %v464_v54, %v997_v34  ;;  %v508_v25 = vsel %vm236_vm1, %v488_v63, %v507_v11  ;;  %v620_v63 = vld [vmem:[%s1195_s5 + $0x40] sm:$0xff] }
 0x19c   :  { %v450_v62 = vmul.f32 %v746_v27, %v449_v56  ;;  %v406_v50 = vmul.f32 %v748_v52, %v1052_v32  ;;  %vm412_vm11 = vweird.f32 %v748_v52  ;;  %v516_v32 = vperm.slane %v508_v25, %v937_v47 }
 0x19d   :  { %v530_v1 = vsel %vm236_vm1, %v529_v58, %v490_v59  ;;  %v531_v3 = vrot.slane %v490_v59, 4  ;;  %vm413_vm13 = vmor %vm411_vm12, %vm412_vm11 }
 0x19e   :  { %v454_v16 = vsel %vm453_vm8, %v746_v27, %v450_v62  ;;  %v407_v4 = vmul.f32 %v748_v52, %v406_v50  ;;  %v536_v34 = vperm.slane %v530_v1, %v937_v47  ;;  %v512_v27 = vperm.slane %v506_v60, %v937_v47  ;;  %v618_v1 = vld [vmem:[%s1195_s5 + $0x30] sm:$0xff] }
 0x19f   :  { %v489_v8 = vmul.f32 %v454_v16, %v977_v22  ;;  %v532_v13 = vsel %vm236_vm1, %v492_v46, %v531_v3  ;;  %v553_v45 = vrot.slane %v516_v32, 4  ;;  %v617_v3 = vld [vmem:[%s1195_s5 + $0x28] sm:$0xff]  ;;  %v616_v16 = vld [vmem:[%s1195_s5 + $0x20] sm:$0xff] }
 0x1a0   :  { %v408_v9 = vmul.f32 0.5, %v407_v4  ;;  %v540_v10 = vperm.slane %v532_v13, %v937_v47  ;;  %v559_v15 = vrot.slane %v536_v34, 4  ;;  %v541_v42 = vrot.slane %v512_v27, 4  ;;  %v615_v4 = vld [vmem:[%s1195_s5 + $0x18] sm:$0xff] }
 0x1a1   :  { %v518_v48 = vsel %vm236_vm1, %v517_v6, %v489_v8  ;;  %v519_v12 = vrot.slane %v489_v8, 4  ;;  %v613_v6 = vld [vmem:[%s1195_s5 + $0x8] sm:$0xff]  ;;  %v612_v8 = vld [vmem:[%s1195_s5] sm:$0xff] }
 0x1a2   :  { %v524_v7 = vperm.slane %v518_v48, %v937_v47  ;;  %v409_v14 = vsub.f32 1.5, %v408_v9  ;;  %v571_v18 = vrot.slane %v540_v10, 4 }
 0x1a3   :  { %v520_v22 = vsel %vm236_vm1, %v491_v57, %v519_v12 }
 0x1a4   :  { %v410_v19 = vmul.f32 %v748_v52, %v409_v14  ;;  %v528_v21 = vperm.slane %v520_v22, %v937_v47  ;;  %v561_v24 = vrot.slane %v524_v7, 4  ;;  %v560_v29 = vsel %vm236_vm1, %v559_v15, %v524_v7  ;;  %v732_v7 = vld [vmem:[%s1196_s6] ss:$0 sm:$0xff] }
 0x1a5   :  { %v566_v37 = vperm.slane %v560_v29, %v943_v53 }
 0x1a6   :  { %v414_v26 = vsel %vm413_vm13, %v748_v52, %v410_v19  ;;  %v572_v33 = vsel %vm236_vm1, %v571_v18, %v528_v21  ;;  %v562_v35 = vsel %vm236_vm1, %v536_v34, %v561_v24  ;;  %v614_v34 = vld [vmem:[%s1195_s5 + $0x10] sm:$0xff] }
 0x1a7   :  { %v485_v31 = vmul.f32 %v414_v26, %v1008_v39  ;;  %v576_v38 = vperm.slane %v572_v33, %v943_v53  ;;  %v570_v41 = vperm.slane %v562_v35, %v943_v53  ;;  %v577_v49 = vrot.slane %v566_v37, 4  ;;  %v674_v26 = vld [vmem:[%s1197_s7] sm:$0xff] }
 0x1a9   :  { %v494_v36 = vsel %vm236_vm1, %v493_v5, %v485_v31  ;;  %v495_v23 = vrot.slane %v485_v31, 4  ;;  %v585_v55 = vrot.slane %v576_v38, 4  ;;  %v581_v54 = vrot.slane %v570_v41, 4 }
 0x1aa   :  { %v500_v40 = vperm.slane %v494_v36, %v937_v47 }
 0x1ab   :  { %v496_v39 = vsel %vm236_vm1, %v487_v17, %v495_v23 }
 0x1ac   :  { %v504_v43 = vperm.slane %v496_v39, %v937_v47  ;;  %v543_v46 = vrot.slane %v500_v40, 4  ;;  %v542_v44 = vsel %vm236_vm1, %v541_v42, %v500_v40 }
 0x1ad   :  { %v548_v20 = vperm.slane %v542_v44, %v943_v53 }
 0x1ae   :  { %v554_v51 = vsel %vm236_vm1, %v553_v45, %v504_v43  ;;  %v544_v28 = vsel %vm236_vm1, %v512_v27, %v543_v46 }
 0x1af   :  { %v558_v56 = vperm.slane %v554_v51, %v943_v53  ;;  %v552_v52 = vperm.slane %v544_v28, %v943_v53  ;;  %v579_v57 = vrot.slane %v548_v20, 4  ;;  %v578_v47 = vsel %vm236_vm1, %v577_v49, %v548_v20  ;;  %v621_v53 = vld [vmem:[%s1195_s5 + $0x48] sm:$0xff] }
 0x1b0   :  { %635 = vmatpush.msra.mxu2 %v621_v53 }
 0x1b1   :  { %v586_v58 = vsel %vm236_vm1, %v585_v55, %v558_v56  ;;  %v582_v59 = vsel %vm236_vm1, %v581_v54, %v552_v52  ;;  %v580_v61 = vsel %vm236_vm1, %v566_v37, %v579_v57  ;;  %v583_v62 = vrot.slane %v552_v52, 4 }
 0x1b2   :  { %600 = vrot.lane.b32.xlu0 %v586_v58, %s774_s28  ;;  %592 = vrot.lane.b32.xlu1 %v582_v59, %s775_s29 }
 0x1b3   :  { %588 = vrot.lane.b32.xlu2 %v580_v61, %s776_s2  ;;  %v584_v50 = vsel %vm236_vm1, %v570_v41, %v583_v62  ;;  %636 = vmatpush.msra.mxu2 %v620_v63  ;;  %vm603_vm1 = vcmask 130048  }
 0x1b5   :  { %637 = vmatpush.msra.mxu2 %v619_v0 }
 0x1b7   :  { %638 = vmatpush.msra.mxu2 %v618_v1 }
 0x1b9   :  { %639 = vmatpush.msra.mxu2 %v617_v3 }
 0x1bb   :  { %596 = vrot.lane.b32.xlu2 %v584_v50, %s777_s30  ;;  %640 = vmatpush.msra.mxu2 %v616_v16 }
 0x1bd   :  { %641 = vmatpush.msra.mxu2 %v615_v4 }
 0x1bf   :  { %642 = vmatpush.msra.mxu2 %v614_v34 }
 0x1c1   :  { %643 = vmatpush.msra.mxu2 %v613_v6 }
 0x1c3   :  { %644 = vmatpush.msra.mxu2 %v612_v8 }
 0x20d   :  { %v589_v13 = vpop.permute.xlu2 %588 }
 0x20e   :  { %v604_v30 = vsel %vm603_vm1, %v578_v47, %v589_v13 }
 0x215   :  { %v597_v10 = vpop.permute.xlu2 %596 }
 0x224   :  { %v593_v9 = vpop.permute.xlu1 %592  ;;  %v601_v11 = vpop.permute.xlu0 %600 }
 0x225   :  { %v605_v2 = vsel %vm48_vm0, %v604_v30, %v593_v9 }
 0x226   :  { %v607_v48 = vsel %vm606_vm14, %v605_v2, %v597_v10 }
 0x227   :  { %v609_v12 = vsel %vm608_vm15, %v607_v48, %v601_v11 }
 0x228   :  { %611 = vst.msk [vmem:[%s1198_s8] sm:$0xff] %vm610_vm2, %v609_v12  ;;  %717 = vmatmul.msk.f32.vlgmr.msra.gmra.mxu2 %vm610_vm2, %v609_v12 }
 0x2ab   :  { %v646_v14 = vpop.f32.mrf.mxu2 }
 0x2ac   :  { %v647_v15 = vadd.f32 %v732_v7, %v646_v14 }
 0x2ae   :  { %v650_v17 = vsel %vm649_vm3, %v647_v15, -inf }
 0x2af   :  { %651 = vmax.xlane.f32.xlu2 %v650_v17 }
 0x322   :  { %v652_v22 = vpop.xlane.xlu2 %651 }
 0x323   :  { %v653_v18 = vsub.f32 %v647_v15, %v652_v22 }
 0x325   :  { %v654_v60 = vmul.f32 1.442695, %v653_v18 }
 0x327   :  { %749 = vpow2.f32 %v654_v60 }
 0x32d   :  { %v750_v19 = vpop.eup %749 }
 0x32e   :  { %v656_v21 = vsel %vm649_vm3, %v750_v19, 0.0 }
 0x32f   :  { %657 = vadd.xlane.f32.xlu1 %v656_v21 }
 0x3a2   :  { %v658_v24 = vpop.xlane.xlu1 %657 }
 0x3a3   :  { %751 = vrcp.f32 %v658_v24 }
 0x3a9   :  { %v752_v25 = vpop.eup %751 }
 0x3aa   :  { %v660_v27 = vmul.f32 %v752_v25, %v750_v19 }
 0x3ac   :  { %661 = vst.msk [vmem:[%s1199_s9] sm:$0xff] %vm649_vm3, %v660_v27  ;;  %v662_v29 = vsel %vm649_vm3, %v660_v27, -inf  ;;  %v675_v5 = vmul.f32 %v674_v26, %v660_v27 }
 0x3ad   :  { %663 = vmax.xlane.f32.xlu0 %v662_v29 }
 0x3ae   :  { %v676_v31 = vsel %vm649_vm3, %v675_v5, 0.0 }
 0x3af   :  { %677 = vadd.xlane.f32.xlu1 %v676_v31 }
 0x420   :  { %v664_v33 = vpop.xlane.xlu0 %663 }
 0x421   :  { %v665_v35 = vsub.f32 %v660_v27, %v664_v33 }
 0x422   :  { %v678_v42 = vpop.xlane.xlu1 %677 }
 0x423   :  { %v666_v32 = vmul.f32 1.442695, %v665_v35 }
 0x425   :  { %753 = vpow2.f32 %v666_v32 }
 0x42b   :  { %v754_v36 = vpop.eup %753 }
 0x42c   :  { %v668_v23 = vsel %vm649_vm3, %v754_v36, 0.0 }
 0x42d   :  { %669 = vadd.xlane.f32.xlu2 %v668_v23 }
 0x4a0   :  { %v670_v37 = vpop.xlane.xlu2 %669 }
 0x4a1   :  { %755 = vlog2.f32 %v670_v37 }
 0x4a7   :  { %v756_v38 = vpop.eup %755 }
 0x4a8   :  { %v672_v40 = vmul.f32 0.6931472, %v756_v38 }
 0x4aa   :  { %v673_v41 = vadd.f32 %v672_v40, %v664_v33 }
 0x4ac   :  { %v679_v39 = vsub.f32 %v673_v41, %v678_v42 }
 0x4ae   :  { %v680_v43 = vrot.slane %v679_v39, 4 }
 0x4b0   :  { %v681_v45 = vadd.f32 %v680_v43, %v679_v39 }
 0x4b2   :  { %v682_v46 = vrot.slane %v681_v45, 2 }
 0x4b4   :  { %v683_v44 = vadd.f32 %v682_v46, %v681_v45 }
 0x4b6   :  { %v684_v20 = vrot.slane %v683_v44, 1 }
 0x4b8   :  { %v685_v49 = vadd.f32 %v684_v20, %v683_v44 }
 0x4ba   :  { %v686_v51 = vmul.f32 0.125, %v685_v49 }
 0x4bc   :  { %722 = vpush %v686_v51 }
 0x4ed   :  { %s723_s12 = spop %722 }
 0x4ee   :  { %689 = sst [smem:[#allocation3]] %s723_s12 }
 0x4ef   :  { %702 = dma.smem_to_hbm %s778_s0, 16, %s700_s11, [#allocation4]  }
 0x4f0   :  { %769 = dma.done.wait [#allocation4], 16  }
 0x4f1   :  { %770 = vsyncadd [#allocation4], 4294967280 }
 0x4f2   :  { %711 = sfence }
 0x4f3   :  { %712 = vsyncpa [#allocation4], 1 }

</bundles_post_ra>
